<compile_context>
chip_gen: v7x
topology: tpu7x:2x2x1
jax: 0.10.0
libtpu: 0.0.40
codegen_flags: <defaults>
</compile_context>

<pallas_src>
import functools

import jax
import jax.numpy as jnp
from jax.experimental import pallas as pl
from jax.experimental.pallas import tpu as pltpu


def _round_up(x, m):
    return (x + m - 1) // m * m


def _channel_layernorm_kernel(x_ref, g_ref, b_ref, o_ref, *, eps):
    # x_ref: (Bblk, C, T) tile of the (B, C, H*W) slab.  Normalize over C
    # (sublane axis); the spatial tile T stays on the lane axis (lane-dense).
    x = x_ref[...].astype(jnp.float32)                        # (Bblk, C, T)
    inv_c = 1.0 / x.shape[1]
    mean = jnp.sum(x, axis=1, keepdims=True) * inv_c          # (Bblk, 1, T)
    centered = x - mean
    # torch.var(dim=1, unbiased=False): centered two-pass form (no cancellation).
    var = jnp.sum(centered * centered, axis=1, keepdims=True) * inv_c
    inv = pl.reciprocal(jnp.sqrt(var) + eps)                  # exact: matches /(std+eps)
    g = g_ref[...].astype(jnp.float32)                        # (1, C, 1)
    b = b_ref[...].astype(jnp.float32)                        # (1, C, 1)
    o_ref[...] = (centered * inv * g + b).astype(o_ref.dtype)


def _choose_tiles(B, C, HW, itemsize, budget_bytes=8 * 1024 * 1024):
    """Pick (batch_block, lane_tile): largest lane tile (multiple of 128), then
    as many whole batch items as still fit the double-buffered in+out budget."""
    hw_pad = _round_up(max(HW, 1), 128)
    c_pad = _round_up(C, 8)                       # sublane padding in VMEM
    per_lane = 4 * c_pad * max(itemsize, 4)       # 2 buffers x (input + output), f32 temps
    t = max(128, (budget_bytes // per_lane) // 128 * 128)
    t = min(t, hw_pad)
    b_cap = max(1, budget_bytes // (per_lane * t))
    b_blk = 1
    for d in range(1, B + 1):
        if B % d == 0 and d <= b_cap:
            b_blk = d
    return b_blk, t


def pallas_channel_layernorm(x_nchw, g, b, eps=1e-5):
    """LayerNorm over the channel dim of an NCHW tensor (matches the torch module)."""
    B, C, H, W = x_nchw.shape
    HW = H * W
    x = x_nchw.reshape(B, C, HW)                  # free reshape, no transpose pass

    itemsize = jnp.dtype(x.dtype).itemsize
    b_blk, T = _choose_tiles(B, C, HW, itemsize)
    n_tiles = pl.cdiv(HW, T)
    HW_total = n_tiles * T
    if HW_total != HW:
        # TODO(synk): mask the boundary tile in-kernel instead of this extra HBM
        # pad pass; only hit when H*W is not already a multiple of 128.
        x = jnp.pad(x, ((0, 0), (0, 0), (0, HW_total - HW)))

    g3 = g.reshape(1, C, 1)
    b3 = b.reshape(1, C, 1)

    out = pl.pallas_call(
        functools.partial(_channel_layernorm_kernel, eps=eps),
        out_shape=jax.ShapeDtypeStruct((B, C, HW_total), x.dtype),
        grid_spec=pltpu.PrefetchScalarGridSpec(
            num_scalar_prefetch=0,
            grid=(B // b_blk, n_tiles),
            in_specs=[
                pl.BlockSpec((b_blk, C, T), lambda bi, j: (bi, 0, j)),
                pl.BlockSpec((1, C, 1), lambda bi, j: (0, 0, 0)),
                pl.BlockSpec((1, C, 1), lambda bi, j: (0, 0, 0)),
            ],
            out_specs=pl.BlockSpec((b_blk, C, T), lambda bi, j: (bi, 0, j)),
        ),
        compiler_params=pltpu.CompilerParams(
            dimension_semantics=("parallel", "parallel"),
            vmem_limit_bytes=32 * 1024 * 1024,
        ),
    )(x, g3, b3)

    if HW_total != HW:
        out = out[:, :, :HW]
    return out.reshape(B, C, H, W)


class PreNorm:
    """JAX/Pallas mirror of the PyTorch PreNorm module (channel LayerNorm + fn)."""

    def __init__(self, dim, fn, eps=1e-5):
        self.eps = eps
        self.fn = fn
        # nn.Parameter(torch.ones/zeros(1, dim, 1, 1))
        self.g = jnp.ones((1, dim, 1, 1), dtype=jnp.float32)
        self.b = jnp.zeros((1, dim, 1, 1), dtype=jnp.float32)

    def __call__(self, x, **kwargs):
        x = pallas_channel_layernorm(x, self.g, self.b, eps=self.eps)
        # TODO(synk): fn is an arbitrary user-supplied module; when it is a cheap
        # elementwise op it should be fused into the kernel epilogue instead of
        # costing an extra HBM read+write pass here.
        return self.fn(x, **kwargs)


def _reference_prenorm(x, g, b, eps, fn):
    mean = jnp.mean(x, axis=1, keepdims=True)
    var = jnp.mean((x - mean) ** 2, axis=1, keepdims=True)
    std = jnp.sqrt(var)
    y = (x - mean) / (std + eps) * g + b
    return fn(y)


if __name__ == "__main__":
    key = jax.random.PRNGKey(0)
    B, C, H, W = 2, 4, 16, 16
    x = jax.random.normal(key, (B, C, H, W), dtype=jnp.float32)

    fn = lambda t: t  # identity wrapped function for the demo
    module = PreNorm(C, fn)

    out = jax.block_until_ready(module(x))
    ref = _reference_prenorm(x, module.g, module.b, module.eps, fn)

    assert out.shape == x.shape
    assert jnp.allclose(out, ref, atol=1e-4, rtol=1e-4), "mismatch vs reference"

    print("KERNEL_OK")
</pallas_src>

<mosaic_0001>
module attributes {stable_mosaic.version = 11 : i64} {
  func.func @_channel_layernorm_kernel(%arg0: i32, %arg1: i32, %arg2: memref<2x4x256xf32, #tpu.memory_space<vmem>>, %arg3: memref<1x4x1xf32, #tpu.memory_space<vmem>>, %arg4: memref<1x4x1xf32, #tpu.memory_space<vmem>>, %arg5: memref<2x4x256xf32, #tpu.memory_space<vmem>>) attributes {dimension_semantics = [#tpu.dimension_semantics<parallel>, #tpu.dimension_semantics<parallel>], iteration_bounds = array<i64: 1, 1>, scalar_prefetch = 0 : i64, scratch_operands = 0 : i64, tpu.core_type = #tpu.core_type<tc>, window_params = [{transform_indices = @transform_0, window_bounds = array<i64: 2, 4, 256>}, {pipeline_mode = #tpu.pipeline_mode<synchronous>, transform_indices = @transform_1, window_bounds = array<i64: 1, 4, 1>}, {pipeline_mode = #tpu.pipeline_mode<synchronous>, transform_indices = @transform_2, window_bounds = array<i64: 1, 4, 1>}, {transform_indices = @transform_3, window_bounds = array<i64: 2, 4, 256>}]} {
    %c0 = arith.constant 0 : index
    %c0_0 = arith.constant 0 : index
    %c0_1 = arith.constant 0 : index
    %0 = vector.load %arg2[%c0, %c0_0, %c0_1] : memref<2x4x256xf32, #tpu.memory_space<vmem>>, vector<2x4x256xf32>
    %cst = arith.constant dense<0.000000e+00> : vector<2x256xf32>
    %1 = vector.multi_reduction <add>, %0, %cst [1] : vector<2x4x256xf32> to vector<2x256xf32>
    %2 = vector.shape_cast %1 : vector<2x256xf32> to vector<2x1x256xf32>
    %cst_2 = arith.constant 2.500000e-01 : f32
    %3 = vector.broadcast %cst_2 : f32 to vector<2x1x256xf32>
    %4 = arith.mulf %2, %3 : vector<2x1x256xf32>
    %5 = vector.broadcast %4 : vector<2x1x256xf32> to vector<2x4x256xf32>
    %6 = arith.subf %0, %5 : vector<2x4x256xf32>
    %7 = arith.mulf %6, %6 : vector<2x4x256xf32>
    %cst_3 = arith.constant dense<0.000000e+00> : vector<2x256xf32>
    %8 = vector.multi_reduction <add>, %7, %cst_3 [1] : vector<2x4x256xf32> to vector<2x256xf32>
    %9 = vector.shape_cast %8 : vector<2x256xf32> to vector<2x1x256xf32>
    %cst_4 = arith.constant 2.500000e-01 : f32
    %10 = vector.broadcast %cst_4 : f32 to vector<2x1x256xf32>
    %11 = arith.mulf %9, %10 : vector<2x1x256xf32>
    %12 = math.sqrt %11 : vector<2x1x256xf32>
    %cst_5 = arith.constant 9.99999974E-6 : f32
    %13 = vector.broadcast %cst_5 : f32 to vector<2x1x256xf32>
    %14 = arith.addf %12, %13 : vector<2x1x256xf32>
    %15 = tpu.reciprocal %14 : vector<2x1x256xf32> -> vector<2x1x256xf32>
    %c0_6 = arith.constant 0 : index
    %c0_7 = arith.constant 0 : index
    %c0_8 = arith.constant 0 : index
    %16 = vector.load %arg3[%c0_6, %c0_7, %c0_8] : memref<1x4x1xf32, #tpu.memory_space<vmem>>, vector<1x4x1xf32>
    %c0_9 = arith.constant 0 : index
    %c0_10 = arith.constant 0 : index
    %c0_11 = arith.constant 0 : index
    %17 = vector.load %arg4[%c0_9, %c0_10, %c0_11] : memref<1x4x1xf32, #tpu.memory_space<vmem>>, vector<1x4x1xf32>
    %18 = vector.broadcast %15 : vector<2x1x256xf32> to vector<2x4x256xf32>
    %19 = arith.mulf %6, %18 : vector<2x4x256xf32>
    %20 = vector.broadcast %16 : vector<1x4x1xf32> to vector<2x4x256xf32>
    %21 = arith.mulf %19, %20 : vector<2x4x256xf32>
    %22 = vector.broadcast %17 : vector<1x4x1xf32> to vector<2x4x256xf32>
    %23 = arith.addf %21, %22 : vector<2x4x256xf32>
    %c0_12 = arith.constant 0 : index
    %c0_13 = arith.constant 0 : index
    %c0_14 = arith.constant 0 : index
    %24 = vector.load %arg5[%c0_12, %c0_13, %c0_14] : memref<2x4x256xf32, #tpu.memory_space<vmem>>, vector<2x4x256xf32>
    tpu.vector_store %arg5[%c0_12, %c0_13, %c0_14], %23 {strides = array<i32>} : memref<2x4x256xf32, #tpu.memory_space<vmem>>, vector<2x4x256xf32>,
    return
  }
  func.func @transform_0(%arg0: i32, %arg1: i32) -> (i32, i32, i32) {
    %c0_i32 = arith.constant 0 : i32
    %c0_i32_0 = arith.constant 0 : i32
    return %arg0, %c0_i32, %arg1 : i32, i32, i32
  }
  func.func @transform_1(%arg0: i32, %arg1: i32) -> (i32, i32, i32) {
    %c0_i32 = arith.constant 0 : i32
    %c0_i32_0 = arith.constant 0 : i32
    %c0_i32_1 = arith.constant 0 : i32
    %c0_i32_2 = arith.constant 0 : i32
    return %c0_i32, %c0_i32_0, %c0_i32_1 : i32, i32, i32
  }
  func.func @transform_2(%arg0: i32, %arg1: i32) -> (i32, i32, i32) {
    %c0_i32 = arith.constant 0 : i32
    %c0_i32_0 = arith.constant 0 : i32
    %c0_i32_1 = arith.constant 0 : i32
    %c0_i32_2 = arith.constant 0 : i32
    return %c0_i32, %c0_i32_0, %c0_i32_1 : i32, i32, i32
  }
  func.func @transform_3(%arg0: i32, %arg1: i32) -> (i32, i32, i32) {
    %c0_i32 = arith.constant 0 : i32
    %c0_i32_0 = arith.constant 0 : i32
    return %arg0, %c0_i32, %arg1 : i32, i32, i32
  }
}

</mosaic_0001>

<bundles_post_ra>
// kernel: tpu_custom_call.1
= control target key start
LH: loop header
LB: loop body
LE: loop exit
PB: predicated region body
PF: predicated region fallthrough
CT: control target
= control target key end

     0   :  { %8 = vsyncpa [#allocation3], 0  ;;  %s368_s0 = inlined_call_operand.hbm [shape: f32[2,4,256], index: 0, kind: input, shape index: {}]   ;;  %s369_s1 = inlined_call_operand.vmem [shape: f32[1,4,1], index: 1, kind: input, shape index: {}]   ;;  %s370_s2 = inlined_call_operand.vmem [shape: f32[1,4,1], index: 2, kind: input, shape index: {}]   ;;  %s371_s3 = inlined_call_operand.hbm [shape: f32[2,4,256], index: 3, kind: output, shape index: {}]  }
   0x1   :  { %9 = vsyncpa [#allocation4], 0  ;;  %s288_s12 = smov [#allocation2]   ;;  %s240_s16 = scalar_lea.hbm %s368_s0, 256 }
   0x2   :  { %s15_s13 = sshll.u32 %s288_s12, 4  ;;  %p241_p0 = scmp.ne.s32.totalorder %s368_s0, %s240_s16  ;;  %s16_s13 = int_to_ptr.vmem [resolvable:$true] %s15_s13 }
   0x3   :  { %p244_p1 = scmp.lt.u32.totalorder %s240_s16, %s368_s0 }
   0x5   :  { %p246_p2 = pnand %p244_p1, %p241_p0 }
   0x7   :  { %249 = shalt.err (!%p246_p2)
}
   0x8   :  { %s250_s21 = scalar_lea.vmem %s16_s13, 256  ;;  %p255_p4 = scmp.lt.s32.totalorder %s16_s13, %s16_s13 }
   0x9   :  { %p251_p3 = scmp.ne.s32.totalorder %s16_s13, %s250_s21  ;;  %p256_p5 = scmp.lt.s32.totalorder %s250_s21, %s250_s21 }
   0xb   :  { %p257_p6 = por %p256_p5, %p255_p4 }
   0xd   :  { %p258_p7 = pnand %p257_p6, %p251_p3 }
   0xf   :  { %261 = shalt.err (!%p258_p7)
}
  0x10   :  { %s289_s22 = smov 128   ;;  %s290_s23 = smov 8  }
  0x11   :  { %21 = dma.hbm_to_vmem [thread:$0]  %s368_s0, 256, %s16_s13, [#allocation3], %s289_s22, %s289_s22, %s290_s23  }
  0x12   :  { %284 = dma.done.wait [#allocation3], 256  }
  0x13   :  { %285 = vsyncadd [#allocation3], 4294967040  ;;  %v291_v0 = vmov 0   ;;  %v156_v1 = vld [vmem:[%s369_s1] sm:$0xf]  ;;  %v30_v3 = vld [vmem:[#allocation2 + $0x8] sm:$0xff] }
  0x14   :  { %221 = vset.pattern.permute.xlu0 %v291_v0  ;;  %v29_v2 = vld [vmem:[#allocation2] sm:$0xff]  ;;  %vm37_vm0 = vcmask 1043456   ;;  %v34_v6 = vcombine.high %v30_v3, %v30_v3  ;;  %s293_s0 = smov [#allocation5]  }
  0x15   :  { %170 = vperm.xlu0 %221, %v156_v1   ;;  %v157_v4 = vld [vmem:[%s370_s2] sm:$0xf]  ;;  %v33_v5 = vcombine.high %v29_v2, %v29_v2  ;;  %v38_v7 = vsel %vm37_vm0, %v29_v2, 0.0  ;;  %v52_v9 = vsel %vm37_vm0, %v30_v3, 0.0  ;;  %s203_s1 = sshll.u32 %s293_s0, 4  ;;  %s204_s1 = int_to_ptr.vmem [resolvable:$true] %s203_s1 }
  0x16   :  { %v59_v10 = vsel %vm37_vm0, %v34_v6, 0.0  ;;  %v39_v11 = vrot.slane %v38_v7, 4  ;;  %v53_v13 = vrot.slane %v52_v9, 4  ;;  %s262_s2 = scalar_lea.vmem %s204_s1, 256  ;;  %p267_p9 = scmp.lt.s32.totalorder %s204_s1, %s204_s1 }
  0x17   :  { %v45_v8 = vsel %vm37_vm0, %v33_v5, 0.0  ;;  %v60_v14 = vrot.slane %v59_v10, 4  ;;  %p263_p8 = scmp.ne.s32.totalorder %s204_s1, %s262_s2  ;;  %p268_p10 = scmp.lt.s32.totalorder %s262_s2, %s262_s2 }
  0x18   :  { %v46_v12 = vrot.slane %v45_v8, 4  ;;  %v40_v15 = vadd.f32 %v39_v11, %v38_v7  ;;  %v54_v17 = vadd.f32 %v53_v13, %v52_v9 }
  0x19   :  { %184 = vperm.xlu0 %221, %v157_v4   ;;  %v61_v18 = vadd.f32 %v60_v14, %v59_v10  ;;  %p269_p11 = por %p268_p10, %p267_p9 }
  0x1a   :  { %v47_v16 = vadd.f32 %v46_v12, %v45_v8  ;;  %v41_v19 = vrot.slane %v40_v15, 2  ;;  %v55_v21 = vrot.slane %v54_v17, 2 }
  0x1b   :  { %v62_v22 = vrot.slane %v61_v18, 2  ;;  %p270_p12 = pnand %p269_p11, %p263_p8 }
  0x1c   :  { %v48_v20 = vrot.slane %v47_v16, 2  ;;  %v42_v23 = vadd.f32 %v41_v19, %v40_v15  ;;  %v56_v25 = vadd.f32 %v55_v21, %v54_v17 }
  0x1d   :  { %v63_v26 = vadd.f32 %v62_v22, %v61_v18 }
  0x1e   :  { %v49_v24 = vadd.f32 %v48_v20, %v47_v16  ;;  %v43_v27 = vrot.slane %v42_v23, 1  ;;  %v57_v29 = vrot.slane %v56_v25, 1 }
  0x1f   :  { %v64_v30 = vrot.slane %v63_v26, 1 }
  0x20   :  { %v50_v28 = vrot.slane %v49_v24, 1  ;;  %v44_v31 = vadd.f32 %v43_v27, %v42_v23  ;;  %v58_v33 = vadd.f32 %v57_v29, %v56_v25 }
  0x21   :  { %v65_v34 = vadd.f32 %v64_v30, %v63_v26 }
  0x22   :  { %v51_v32 = vadd.f32 %v50_v28, %v49_v24  ;;  %v66_v35 = vmul.f32 0.25, %v44_v31  ;;  %v68_v37 = vmul.f32 0.25, %v58_v33 }
  0x23   :  { %v69_v38 = vmul.f32 0.25, %v65_v34 }
  0x24   :  { %v67_v36 = vmul.f32 0.25, %v51_v32 }
  0x25   :  { %v75_v40 = vcombine.low %v68_v37, %v69_v38 }
  0x26   :  { %v74_v39 = vcombine.low %v66_v35, %v67_v36 }
  0x27   :  { %v341_v42 = vsub.f32 %v30_v3, %v75_v40 }
  0x28   :  { %v339_v41 = vsub.f32 %v29_v2, %v74_v39  ;;  %v292_v39 = vmov 839922192  }
  0x29   :  { %v81_v44 = vmul.f32 %v341_v42, %v341_v42  ;;  %v173_v40 = vunpack.c.l.s4 %v292_v39 }
  0x2a   :  { %v80_v43 = vmul.f32 %v339_v41, %v339_v41 }
  0x2b   :  { %v85_v46 = vcombine.high %v81_v44, %v81_v44  ;;  %v102_v48 = vsel %vm37_vm0, %v81_v44, 0.0 }
  0x2c   :  { %v84_v45 = vcombine.high %v80_v43, %v80_v43  ;;  %v88_v47 = vsel %vm37_vm0, %v80_v43, 0.0  ;;  %v103_v52 = vrot.slane %v102_v48, 4  ;;  %v175_v43 = vlaneseq }
  0x2d   :  { %v89_v50 = vrot.slane %v88_v47, 4  ;;  %v109_v51 = vsel %vm37_vm0, %v85_v46, 0.0 }
  0x2e   :  { %v95_v49 = vsel %vm37_vm0, %v84_v45, 0.0  ;;  %v110_v54 = vrot.slane %v109_v51, 4  ;;  %v104_v56 = vadd.f32 %v103_v52, %v102_v48  ;;  %v176_v48 = vshrl.u32 %v175_v43, 7 }
  0x2f   :  { %v96_v53 = vrot.slane %v95_v49, 4  ;;  %v90_v55 = vadd.f32 %v89_v50, %v88_v47  ;;  %v174_v47 = vunpack.c.0.s8 %v173_v40 }
  0x30   :  { %v111_v58 = vadd.f32 %v110_v54, %v109_v51  ;;  %v105_v60 = vrot.slane %v104_v56, 2 }
  0x31   :  { %v97_v57 = vadd.f32 %v96_v53, %v95_v49  ;;  %v91_v59 = vrot.slane %v90_v55, 2  ;;  %v177_v50 = vsub.s32 %v174_v47, %v176_v48 }
  0x32   :  { %v112_v62 = vrot.slane %v111_v58, 2  ;;  %v106_v0 = vadd.f32 %v105_v60, %v104_v56 }
  0x33   :  { %v98_v61 = vrot.slane %v97_v57, 2  ;;  %v92_v63 = vadd.f32 %v91_v59, %v90_v55 }
  0x34   :  { %v113_v2 = vadd.f32 %v112_v62, %v111_v58  ;;  %v107_v4 = vrot.slane %v106_v0, 1 }
  0x35   :  { %v99_v1 = vadd.f32 %v98_v61, %v97_v57  ;;  %v93_v3 = vrot.slane %v92_v63, 1 }
  0x36   :  { %v114_v6 = vrot.slane %v113_v2, 1  ;;  %v108_v8 = vadd.f32 %v107_v4, %v106_v0 }
  0x37   :  { %v100_v5 = vrot.slane %v99_v1, 1  ;;  %v94_v7 = vadd.f32 %v93_v3, %v92_v63 }
  0x38   :  { %v115_v10 = vadd.f32 %v114_v6, %v113_v2  ;;  %v118_v12 = vmul.f32 0.25, %v108_v8 }
  0x39   :  { %v101_v9 = vadd.f32 %v100_v5, %v99_v1  ;;  %v116_v11 = vmul.f32 0.25, %v94_v7 }
  0x3a   :  { %v119_v14 = vmul.f32 0.25, %v115_v10  ;;  %vm136_vm2 = vcmp.eq.f32.partialorder %v118_v12, inf  ;;  %v139_v25 = vand.u32 2147483648, %v118_v12  ;;  %vm138_vm6 = vcmp.eq.f32.partialorder %v118_v12, 0.0 }
  0x3b   :  { %v117_v13 = vmul.f32 0.25, %v101_v9  ;;  %224 = vrsqrt.f32 %v116_v11  ;;  %vm122_vm1 = vcmp.eq.f32.partialorder %v116_v11, inf  ;;  %v125_v22 = vand.u32 2147483648, %v116_v11 }
  0x3c   :  { %226 = vrsqrt.f32 %v118_v12  ;;  %vm124_vm4 = vcmp.eq.f32.partialorder %v116_v11, 0.0  ;;  %vm143_vm5 = vcmp.eq.f32.partialorder %v119_v14, inf  ;;  %v146_v29 = vand.u32 2147483648, %v119_v14 }
  0x3d   :  { %228 = vrsqrt.f32 %v117_v13  ;;  %vm129_vm3 = vcmp.eq.f32.partialorder %v117_v13, inf  ;;  %v132_v26 = vand.u32 2147483648, %v117_v13  ;;  %vm131_vm7 = vcmp.eq.f32.partialorder %v117_v13, 0.0 }
  0x3e   :  { %230 = vrsqrt.f32 %v119_v14  ;;  %vm145_vm8 = vcmp.eq.f32.partialorder %v119_v14, 0.0 }
  0x45   :  { %v225_v15 = vpop.eup %224 }
  0x46   :  { %v227_v16 = vpop.eup %226  ;;  %v121_v19 = vmul.f32 %v225_v15, %v116_v11 }
  0x47   :  { %v229_v17 = vpop.eup %228  ;;  %v135_v20 = vmul.f32 %v227_v16, %v118_v12 }
  0x48   :  { %v231_v18 = vpop.eup %230  ;;  %v128_v21 = vmul.f32 %v229_v17, %v117_v13  ;;  %v123_v24 = vsel %vm122_vm1, %v116_v11, %v121_v19 }
  0x49   :  { %v142_v23 = vmul.f32 %v231_v18, %v119_v14  ;;  %v137_v27 = vsel %vm136_vm2, %v118_v12, %v135_v20  ;;  %v126_v30 = vsel %vm124_vm4, %v125_v22, %v123_v24 }
  0x4a   :  { %v130_v28 = vsel %vm129_vm3, %v117_v13, %v128_v21  ;;  %v140_v32 = vsel %vm138_vm6, %v139_v25, %v137_v27  ;;  %v148_v35 = vadd.f32 1e-05, %v126_v30 }
  0x4b   :  { %v144_v31 = vsel %vm143_vm5, %v119_v14, %v142_v23  ;;  %v133_v33 = vsel %vm131_vm7, %v132_v26, %v130_v28  ;;  %v150_v36 = vadd.f32 1e-05, %v140_v32 }
  0x4c   :  { %v147_v34 = vsel %vm145_vm8, %v146_v29, %v144_v31  ;;  %v149_v37 = vadd.f32 1e-05, %v133_v33  ;;  %232 = vrcp.f32 %v148_v35 }
  0x4d   :  { %v151_v38 = vadd.f32 1e-05, %v147_v34  ;;  %234 = vrcp.f32 %v150_v36 }
  0x4e   :  { %236 = vrcp.f32 %v149_v37 }
  0x4f   :  { %238 = vrcp.f32 %v151_v38 }
  0x56   :  { %v233_v44 = vpop.eup %232 }
  0x57   :  { %v235_v45 = vpop.eup %234 }
  0x58   :  { %v237_v46 = vpop.eup %236 }
  0x59   :  { %v239_v49 = vpop.eup %238  ;;  %v162_v51 = vcombine.low %v233_v44, %v237_v46 }
  0x5a   :  { %v163_v52 = vcombine.low %v235_v45, %v239_v49 }
  0x5b   :  { %v166_v54 = vmul.f32 %v162_v51, %v339_v41 }
  0x5c   :  { %v167_v55 = vmul.f32 %v163_v52, %v341_v42 }
  0x94   :  { %v171_v53 = vpop.permute.xlu0 %170 }
  0x95   :  { %v178_v56 = vrot.slane %v171_v53, %v177_v50 }
  0x97   :  { %v180_v58 = vmul.f32 %v178_v56, %v166_v54  ;;  %v181_v59 = vmul.f32 %v178_v56, %v167_v55 }
  0x98   :  { %v185_v57 = vpop.permute.xlu0 %184 }
  0x99   :  { %v192_v60 = vrot.slane %v185_v57, %v177_v50 }
  0x9b   :  { %v194_v61 = vadd.f32 %v192_v60, %v180_v58  ;;  %v195_v62 = vadd.f32 %v192_v60, %v181_v59 }
  0x9d   :  { %196 = vst [vmem:[#allocation5] sm:$0xff] %v194_v61  ;;  %197 = vst [vmem:[#allocation5 + $0x8] sm:$0xff] %v195_v62 }
  0x9e   :  { %273 = shalt.err (!%p270_p12)
}
  0x9f   :  { %s274_s5 = scalar_lea.hbm %s371_s3, 256 }
  0xa0   :  { %p275_p13 = scmp.ne.s32.totalorder %s371_s3, %s274_s5  ;;  %p278_p0 = scmp.lt.u32.totalorder %s274_s5, %s371_s3 }
  0xa2   :  { %p280_p1 = pnand %p278_p0, %p275_p13 }
  0xa4   :  { %283 = shalt.err (!%p280_p1)
}
  0xa5   :  { %209 = dma.vmem_to_hbm [thread:$0]  %s204_s1, 256, %s371_s3, [#allocation4], %s289_s22, %s289_s22, %s290_s23  }
  0xa6   :  { %286 = dma.done.wait [#allocation4], 256  }
  0xa7   :  { %287 = vsyncadd [#allocation4], 4294967040 }
  0xa8   :  { %213 = vsyncpa [#allocation3], 1 }
  0xa9   :  { %214 = vsyncpa [#allocation4], 1 }

</bundles_post_ra>
